<compile_context>
chip_gen: v5e
topology: v5e:2x2
jax: 0.10.0
libtpu: 0.0.40
codegen_flags: <defaults>
</compile_context>

<pallas_src>
import functools

import jax
import jax.numpy as jnp
from jax.experimental import pallas as pl
from jax.experimental.pallas import tpu as pltpu

_LANE = 128
_SUBLANE = 8
_TARGET_BLOCK_BYTES = 2 << 20   # ~2 MiB per input block (x2 for double-buffer)
_UNROLL_C_MAX = 32              # fully unroll the channel loop up to this C


def _argmax_kernel(x_ref, o_ref, *, assume_finite):
    # x_ref block: (1, C, s_sub, 128) ; o_ref block: (1, 1, s_sub, 128)
    C = x_ref.shape[1]
    is_float = jnp.issubdtype(x_ref.dtype, jnp.floating) and not assume_finite

    best_val = x_ref[0, 0, :, :]                           # (s_sub, 128)
    best_idx = jnp.zeros(best_val.shape, dtype=jnp.int32)  # (s_sub, 128)
    best_nan = jnp.isnan(best_val) if is_float else None

    # Strict '>' keeps the FIRST index on ties (torch.argmax semantics).
    # NaN handling: first NaN wins and sticks (torch / numpy argmax semantics);
    # the NaN state is carried as a mask so isnan(best_val) is never recomputed.
    def step(c, v, best_val, best_idx, best_nan):
        take = v > best_val
        if is_float:
            v_nan = jnp.isnan(v)
            take = take | (v_nan & ~best_nan)
            best_nan = best_nan | v_nan
        best_val = jnp.where(take, v, best_val)
        best_idx = jnp.where(take, jnp.asarray(c, jnp.int32), best_idx)
        return best_val, best_idx, best_nan

    if C <= _UNROLL_C_MAX:
        for c in range(1, C):
            best_val, best_idx, best_nan = step(
                c, x_ref[0, c, :, :], best_val, best_idx, best_nan)
    else:
        # TODO(synk): for C so large that C*8*128*itemsize overflows scoped
        # VMEM, add a channel-tiled "arbitrary" grid axis with scratch carry.
        if is_float:
            def body(c, carry):
                return step(c, x_ref[0, c, :, :], *carry)
            best_val, best_idx, best_nan = jax.lax.fori_loop(
                1, C, body, (best_val, best_idx, best_nan), unroll=8)
        else:
            def body(c, carry):
                bv, bi, _ = step(c, x_ref[0, c, :, :], carry[0], carry[1], None)
                return (bv, bi)
            best_val, best_idx = jax.lax.fori_loop(
                1, C, body, (best_val, best_idx), unroll=8)

    o_ref[0, 0, :, :] = best_idx


def _pick_s_sub_tile(C, S_sub, itemsize, n_batch):
    """Rows (of 128 lanes) per block: ~2 MiB input block, sublane-legal."""
    row_bytes = C * _LANE * itemsize                 # one sublane-row of the block
    tile = max(1, _TARGET_BLOCK_BYTES // row_bytes)
    if n_batch == 1:
        # v7x has 2 TensorCores: make sure the grid has >= 2 steps when possible.
        tile = min(tile, max(1, pl.cdiv(S_sub, 2)))
    if tile >= S_sub:
        return S_sub                                  # full extent: always legal
    tile = (tile // _SUBLANE) * _SUBLANE              # partial tile: multiple of 8
    if tile == 0:
        tile = _SUBLANE if S_sub > _SUBLANE else S_sub
    return tile


def argmax_nchw(x, *, assume_finite=False):
    """ArgMax over dim=1 with keepdim=True for an NCHW tensor."""
    N, C, H, W = x.shape
    S = H * W
    S_pad = pl.cdiv(S, _LANE) * _LANE

    x3 = x.reshape(N, C, S)
    if S_pad != S:
        # Cheap pad to the 128-lane boundary only (not to the tile size);
        # padded lanes only influence padded outputs, which are sliced off.
        x3 = jnp.pad(x3, ((0, 0), (0, 0), (0, S_pad - S)))
    S_sub = S_pad // _LANE
    x4 = x3.reshape(N, C, S_sub, _LANE)

    s_sub = _pick_s_sub_tile(C, S_sub, x.dtype.itemsize, N)
    grid = (N, pl.cdiv(S_sub, s_sub))

    out = pl.pallas_call(
        functools.partial(_argmax_kernel, assume_finite=assume_finite),
        out_shape=jax.ShapeDtypeStruct((N, 1, S_sub, _LANE), jnp.int32),
        grid_spec=pltpu.PrefetchScalarGridSpec(
            num_scalar_prefetch=0,
            grid=grid,
            in_specs=[pl.BlockSpec((1, C, s_sub, _LANE),
                                   lambda n, s: (n, 0, s, 0))],
            out_specs=pl.BlockSpec((1, 1, s_sub, _LANE),
                                   lambda n, s: (n, 0, s, 0)),
        ),
        compiler_params=pltpu.CompilerParams(
            dimension_semantics=("parallel", "parallel"),
        ),
    )(x4)

    out = out.reshape(N, 1, S_pad)
    if S_pad != S:
        out = out[:, :, :S]
    return out.reshape(N, 1, H, W)


if __name__ == "__main__":
    k1, k2, k3 = jax.random.split(jax.random.PRNGKey(0), 3)

    # Main case (NCHW, lane-aligned spatial size).
    x = jax.random.normal(k1, (2, 4, 16, 16), dtype=jnp.float32)
    y = jax.block_until_ready(argmax_nchw(x))
    ref = jnp.argmax(x, axis=1, keepdims=True).astype(jnp.int32)
    assert y.shape == (2, 1, 16, 16), y.shape
    assert y.dtype == jnp.int32
    assert bool(jnp.all(y == ref)), "mismatch vs jnp.argmax (main case)"

    # Ragged spatial size (H*W not a multiple of 128), N=1, heavy ties:
    # exercises the lane-pad path and the first-index-on-ties rule.
    x2 = jax.random.randint(k2, (1, 5, 7, 9), 0, 3).astype(jnp.float32)
    y2 = jax.block_until_ready(argmax_nchw(x2))
    ref2 = jnp.argmax(x2, axis=1, keepdims=True).astype(jnp.int32)
    assert y2.shape == (1, 1, 7, 9)
    assert bool(jnp.all(y2 == ref2)), "mismatch vs jnp.argmax (ragged/ties case)"

    # NaN case: NaN beats any non-NaN (torch / numpy argmax semantics).
    x3 = jax.random.normal(k3, (2, 3, 8, 16), dtype=jnp.float32)
    x3 = x3.at[0, 1, 2, 3].set(jnp.nan)
    y3 = jax.block_until_ready(argmax_nchw(x3))
    ref3 = jnp.argmax(x3, axis=1, keepdims=True).astype(jnp.int32)
    assert bool(jnp.all(y3 == ref3)), "mismatch vs jnp.argmax (NaN case)"

    print("KERNEL_OK")
</pallas_src>

<mosaic_0001>
module attributes {stable_mosaic.version = 11 : i64} {
  func.func @_argmax_kernel(%arg0: i32, %arg1: i32, %arg2: memref<1x4x2x128xf32, #tpu.memory_space<vmem>>, %arg3: memref<1x1x2x128xi32, #tpu.memory_space<vmem>>) attributes {dimension_semantics = [#tpu.dimension_semantics<parallel>, #tpu.dimension_semantics<parallel>], iteration_bounds = array<i64: 2, 1>, scalar_prefetch = 0 : i64, scratch_operands = 0 : i64, tpu.core_type = #tpu.core_type<tc>, window_params = [{transform_indices = @transform_0, window_bounds = array<i64: 1, 4, 2, 128>}, {transform_indices = @transform_1, window_bounds = array<i64: 1, 1, 2, 128>}]} {
    %c0 = arith.constant 0 : index
    %c0_0 = arith.constant 0 : index
    %c0_1 = arith.constant 0 : index
    %c0_2 = arith.constant 0 : index
    %0 = vector.load %arg2[%c0, %c0_0, %c0_1, %c0_2] : memref<1x4x2x128xf32, #tpu.memory_space<vmem>>, vector<1x1x2x128xf32>
    %1 = vector.shape_cast %0 : vector<1x1x2x128xf32> to vector<2x128xf32>
    %c0_i32 = arith.constant 0 : i32
    %2 = vector.broadcast %c0_i32 : i32 to vector<2x128xi32>
    %3 = arith.cmpf one, %1, %1 : vector<2x128xf32>
    %c0_3 = arith.constant 0 : index
    %c1 = arith.constant 1 : index
    %c0_4 = arith.constant 0 : index
    %c0_5 = arith.constant 0 : index
    %4 = vector.load %arg2[%c0_3, %c1, %c0_4, %c0_5] : memref<1x4x2x128xf32, #tpu.memory_space<vmem>>, vector<1x1x2x128xf32>
    %5 = vector.shape_cast %4 : vector<1x1x2x128xf32> to vector<2x128xf32>
    %6 = arith.cmpf ogt, %5, %1 : vector<2x128xf32>
    %7 = arith.cmpf one, %5, %5 : vector<2x128xf32>
    %cst = arith.constant dense<true> : vector<2x128xi1>
    %8 = arith.xori %3, %cst : vector<2x128xi1>
    %9 = arith.andi %7, %8 : vector<2x128xi1>
    %10 = arith.ori %6, %9 : vector<2x128xi1>
    %11 = arith.ori %3, %7 : vector<2x128xi1>
    %12 = arith.select %10, %5, %1 : vector<2x128xi1>, vector<2x128xf32>
    %c1_i32 = arith.constant 1 : i32
    %13 = vector.broadcast %c1_i32 : i32 to vector<2x128xi32>
    %14 = arith.select %10, %13, %2 : vector<2x128xi1>, vector<2x128xi32>
    %c0_6 = arith.constant 0 : index
    %c2 = arith.constant 2 : index
    %c0_7 = arith.constant 0 : index
    %c0_8 = arith.constant 0 : index
    %15 = vector.load %arg2[%c0_6, %c2, %c0_7, %c0_8] : memref<1x4x2x128xf32, #tpu.memory_space<vmem>>, vector<1x1x2x128xf32>
    %16 = vector.shape_cast %15 : vector<1x1x2x128xf32> to vector<2x128xf32>
    %17 = arith.cmpf ogt, %16, %12 : vector<2x128xf32>
    %18 = arith.cmpf one, %16, %16 : vector<2x128xf32>
    %cst_9 = arith.constant dense<true> : vector<2x128xi1>
    %19 = arith.xori %11, %cst_9 : vector<2x128xi1>
    %20 = arith.andi %18, %19 : vector<2x128xi1>
    %21 = arith.ori %17, %20 : vector<2x128xi1>
    %22 = arith.ori %11, %18 : vector<2x128xi1>
    %23 = arith.select %21, %16, %12 : vector<2x128xi1>, vector<2x128xf32>
    %c2_i32 = arith.constant 2 : i32
    %24 = vector.broadcast %c2_i32 : i32 to vector<2x128xi32>
    %25 = arith.select %21, %24, %14 : vector<2x128xi1>, vector<2x128xi32>
    %c0_10 = arith.constant 0 : index
    %c3 = arith.constant 3 : index
    %c0_11 = arith.constant 0 : index
    %c0_12 = arith.constant 0 : index
    %26 = vector.load %arg2[%c0_10, %c3, %c0_11, %c0_12] : memref<1x4x2x128xf32, #tpu.memory_space<vmem>>, vector<1x1x2x128xf32>
    %27 = vector.shape_cast %26 : vector<1x1x2x128xf32> to vector<2x128xf32>
    %28 = arith.cmpf ogt, %27, %23 : vector<2x128xf32>
    %29 = arith.cmpf one, %27, %27 : vector<2x128xf32>
    %cst_13 = arith.constant dense<true> : vector<2x128xi1>
    %30 = arith.xori %22, %cst_13 : vector<2x128xi1>
    %31 = arith.andi %29, %30 : vector<2x128xi1>
    %32 = arith.ori %28, %31 : vector<2x128xi1>
    %c3_i32 = arith.constant 3 : i32
    %33 = vector.broadcast %c3_i32 : i32 to vector<2x128xi32>
    %34 = arith.select %32, %33, %25 : vector<2x128xi1>, vector<2x128xi32>
    %c0_14 = arith.constant 0 : index
    %c0_15 = arith.constant 0 : index
    %c0_16 = arith.constant 0 : index
    %c0_17 = arith.constant 0 : index
    %35 = vector.load %arg3[%c0_14, %c0_15, %c0_16, %c0_17] : memref<1x1x2x128xi32, #tpu.memory_space<vmem>>, vector<1x1x2x128xi32>
    %36 = vector.shape_cast %35 : vector<1x1x2x128xi32> to vector<2x128xi32>
    %37 = vector.shape_cast %34 : vector<2x128xi32> to vector<1x1x2x128xi32>
    tpu.vector_store %arg3[%c0_14, %c0_15, %c0_16, %c0_17], %37 {strides = array<i32>} : memref<1x1x2x128xi32, #tpu.memory_space<vmem>>, vector<1x1x2x128xi32>,
    return
  }
  func.func @transform_0(%arg0: i32, %arg1: i32) -> (i32, i32, i32, i32) {
    %c0_i32 = arith.constant 0 : i32
    %c0_i32_0 = arith.constant 0 : i32
    %c0_i32_1 = arith.constant 0 : i32
    return %arg0, %c0_i32, %arg1, %c0_i32_0 : i32, i32, i32, i32
  }
  func.func @transform_1(%arg0: i32, %arg1: i32) -> (i32, i32, i32, i32) {
    %c0_i32 = arith.constant 0 : i32
    %c0_i32_0 = arith.constant 0 : i32
    %c0_i32_1 = arith.constant 0 : i32
    return %arg0, %c0_i32, %arg1, %c0_i32_0 : i32, i32, i32, i32
  }
}

</mosaic_0001>

<bundles_post_ra>
// kernel: tpu_custom_call.1
= control target key start
LH: loop header
LB: loop body
LE: loop exit
PB: predicated region body
PF: predicated region fallthrough
CT: control target
= control target key end

     0   :  { %6 = vsyncpa [#allocation3], 0  ;;  %s619_s0 = inlined_call_operand.hbm [shape: f32[2,4,2,128], index: 0, kind: input, shape index: {}]   ;;  %s620_s1 = inlined_call_operand.hbm [shape: s32[2,1,2,128], index: 1, kind: output, shape index: {}]  }
   0x1   :  { %8 = vsyncpa [#allocation3 + $0x1], 0 }
   0x2   :  { %9 = vsyncpa [#allocation4], 0 }
   0x3   :  { %11 = vsyncpa [#allocation4 + $0x1], 0  ;;  %s495_s6 = smov 0   ;;  %s497_s7 = smov 0  }
   0x4   :  { %s499_s8 = smov 0   ;;  %s501_s9 = smov 0  }
   0x5   :  { %s503_s10 = smov 0   ;;  %s505_s11 = smov 0  }
   0x6 LB: > { %s283_s12 = sadd.s32 4294967295, %s479_s11   ;;  %s284_s13 = sadd.s32 4294967294, %s479_s11   ;;  %s479_s11 = sphi %s505_s11, %s17_s11   ;;  %s475_s10 = sphi %s503_s10, %s629_s10   ;;  %s471_s9 = sphi %s501_s9, %s628_s9   ;;  %s467_s8 = sphi %s499_s8, %s627_s8   ;;  %s463_s7 = sphi %s497_s7, %s626_s7   ;;  %s459_s6 = sphi %s495_s6, %s625_s6  }
   0x7   : > { %s29_s14 = sadd.s32 1, %s475_s10  ;;  %s38_s15 = sadd.s32 1, %s467_s8 }
   0x8   : > { %p31_p0 = scmp.ge.s32.totalorder %s29_s14, 2  ;;  %p45_p1 = scmp.ne.s32.totalorder %s467_s8, %s463_s7 }
   0x9   : > { %p46_p2 = scmp.eq.s32.totalorder %s479_s11, 0  ;;  %p51_p3 = scmp.ne.s32.totalorder %s463_s7, %s459_s6 }
   0xa   : > { %s631_s14 = smov (%p31_p0, %s29_s14), 0  ;;  %p52_p5 = scmp.eq.s32.totalorder %s283_s12, 0 }
   0xb   : > { %p536_p4 = por %p46_p2, %p45_p1  ;;  %s33_s17 = ssub.s32 %s475_s10, %s631_s14 }
   0xc   : > { %p77_p6 = scmp.eq.s32.totalorder %s283_s12, 1  ;;  %p36_p7 = scmp.eq.s32.totalorder %s33_s17, 0 }
   0xd   : > { %p542_p8 = por %p52_p5, %p51_p3  ;;  %p83_p10 = scmp.eq.s32.totalorder %s284_s13, 1 }
   0xe   : > { %p546_p9 = por %p77_p6, %p45_p1  ;;  %p286_p12 = scmp.ge.s32.totalorder %s479_s11, 2 }
   0xf   : > { %s551_s20 = scalar_select %p36_p7, %s467_s8, %s38_s15  }
  0x10   : > { %p553_p11 = por %p83_p10, %p51_p3  ;;  %p313_p13 = scmp.lt.s32.totalorder %s479_s11, 2 }
  0x11   : > { %s103_s22 = sand.u32 1, %s467_s8   ;;  %s300_s24 = sshll.u32 %s475_s10, 3 }
  0x12   : > { %s287_s23 = sshll.u32 %s103_s22, 3  ;;  %s113_s27 = scalar_lea.hbm %s619_s0, %s300_s24 }
  0x13   : > { %s107_s28 = scalar_lea.vmem [#allocation2], %s287_s23  ;;  %s114_s30 = sshll.u32 %s113_s27, 4  ;;  %s115_s30 = int_to_ptr.hbm [resolvable:$true] %s114_s30 }
  0x14   : > { %s116_s29 = sshll.u32 %s107_s28, 4  ;;  %p306_p0 = pnand %p313_p13, %p536_p4  ;;  %s117_s29 = int_to_ptr.vmem [resolvable:$true] %s116_s29 }
  0x15   : > { %p290_p1 = scmp.ge.s32.totalorder %s479_s11, 1  ;;  %s104_s2 = scalar_lea.sflag [#allocation3], %s103_s22 }
  0x16   : > { %s481_s3 = smov 32   ;;  %s482_s4 = smov 2  }
  0x17   : > { %308 = dma.hbm_to_vmem [thread:$0]  (!%p306_p0), %s115_s30, 128, %s117_s29, %s104_s2, %s481_s3, %s481_s3, %s482_s4  }
  0x18   : > { %p124_p2 = scmp.lt.s32.totalorder %s479_s11, 3 }
  0x1a   : > { %p125_p3 = pnand %p290_p1, %p124_p2 }
  0x1b   : > { %s569_s5 = sand.u32 (!%p125_p3), 1, %s463_s7  }
  0x1c   : > { %128 = sbr.rel (%p125_p3) target bundleno = 51 (0x33), region = 24  ;;  %s291_s12 = sshll.u32 (!%p125_p3), %s569_s5, 3 }
  0x1d   : > { %s131_s13 = scalar_lea.sflag (!%p125_p3), [#allocation3], %s569_s5  ;;  %s134_s15 = scalar_lea.vmem (!%p125_p3), [#allocation2], %s291_s12 }
  0x21   : > { %450 = dma.done.wait (%p542_p8), %s131_s13, 128  }
  0x22   : > { %452 = vsyncadd (%p542_p8), %s131_s13, 4294967168  ;;  %v154_v0 = vld [vmem:[%s134_s15] sm:$0x3]  ;;  %v293_v1 = vld [vmem:[%s134_s15 + $0x2] sm:$0x3]  ;;  %vm483_vm3 = vmmov 1  }
  0x23   : > { %vm155_vm0 = vcmp.ne.f32.partialorder %v154_v0, %v154_v0  ;;  %vm158_vm1 = vcmp.gt.f32.partialorder %v293_v1, %v154_v0  ;;  %vm159_vm2 = vcmp.ne.f32.partialorder %v293_v1, %v293_v1  ;;  %v294_v2 = vld [vmem:[%s134_s15 + $0x4] sm:$0x3]  ;;  %s292_s16 = sshll.u32 %s569_s5, 1  ;;  %s297_s17 = sshll.u32 %s471_s9, 1  ;;  %v295_v4 = vld [vmem:[%s134_s15 + $0x6] sm:$0x3] }
  0x24   : > { %vm160_vm4 = vmxor %vm155_vm0, %vm483_vm3  ;;  %vm169_vm7 = vcmp.ne.f32.partialorder %v294_v2, %v294_v2  ;;  %s197_s23 = scalar_lea.hbm %s620_s1, %s297_s17  ;;  %v484_v5 = vmov 0   ;;  %vm179_vm13 = vcmp.ne.f32.partialorder %v295_v4, %v295_v4  ;;  %s153_s9 = scalar_lea.vmem [#allocation5], %s292_s16 }
  0x25   : > { %vm161_vm5 = vmand %vm159_vm2, %vm160_vm4  ;;  %s199_s24 = sshll.u32 %s153_s9, 4  ;;  %s201_s25 = sshll.u32 %s197_s23, 4  ;;  %s200_s24 = int_to_ptr.vmem [resolvable:$true] %s199_s24  ;;  %s202_s25 = int_to_ptr.hbm [resolvable:$true] %s201_s25 }
  0x26   : > { %vm162_vm6 = vmor %vm158_vm1, %vm161_vm5  ;;  %s186_s26 = scalar_lea.sflag [#allocation4], %s569_s5  ;;  %s411_s27 = sshra.s32 %s202_s25, 4  ;;  %s412_s27 = int_to_ptr.hbm [resolvable:$true] %s411_s27 }
  0x27   : > { %vm163_vm8 = vmor %vm155_vm0, %vm159_vm2  ;;  %v164_v3 = vsel %vm162_vm6, %v293_v1, %v154_v0  ;;  %v165_v6 = vsel %vm162_vm6, 1, %v484_v5  ;;  %s413_s28 = scalar_lea.hbm %s412_s27, 2  ;;  %s417_s2 = scalar_lea.hbm %s620_s1, 4 }
  0x28   : > { %vm168_vm9 = vcmp.gt.f32.partialorder %v294_v2, %v164_v3  ;;  %vm170_vm10 = vmxor %vm163_vm8, %vm483_vm3  ;;  %p414_p4 = scmp.ne.s32.totalorder %s412_s27, %s413_s28  ;;  %p418_p7 = scmp.lt.s32.totalorder %s412_s27, %s620_s1 }
  0x29   : > { %vm171_vm11 = vmand %vm169_vm7, %vm170_vm10  ;;  %p419_p8 = scmp.lt.s32.totalorder %s417_s2, %s413_s28 }
  0x2a   : > { %vm172_vm12 = vmor %vm168_vm9, %vm171_vm11  ;;  %p415_p5 = pnand %p414_p4, %p546_p9 }
  0x2b   : > { %vm173_vm14 = vmor %vm163_vm8, %vm169_vm7  ;;  %v174_v7 = vsel %vm172_vm12, %v294_v2, %v164_v3  ;;  %v175_v8 = vsel %vm172_vm12, 2, %v165_v6  ;;  %p420_p10 = por %p419_p8, %p418_p7 }
  0x2c   : > { %vm178_vm15 = vcmp.gt.f32.partialorder %v295_v4, %v174_v7  ;;  %vm180_vm0 = vmxor %vm173_vm14, %vm483_vm3  ;;  %p416_p6 = pneg %p415_p5 }
  0x2d   : > { %vm181_vm1 = vmand %vm179_vm13, %vm180_vm0 }
  0x2e   : > { %vm182_vm2 = vmor %vm178_vm15, %vm181_vm1  ;;  %p421_p13 = pnand %p420_p10, %p416_p6 }
  0x2f   : > { %v183_v9 = vsel %vm182_vm2, 3, %v175_v8 }
  0x30   : > { %184 = vst [vmem:[%s153_s9] sm:$0x3] %v183_v9 }
  0x31   : > { %424 = shalt.err (!%p421_p13)
}
  0x32   : > { %303 = dma.vmem_to_hbm [thread:$0]  (%p546_p9), %s200_s24, 32, %s202_s25, %s186_s26  }
  0x33 PF: > { %s213_s5 = sand.u32 1, %s459_s6   ;;  %p310_p0 = pnand %p286_p12, %p553_p11 }
  0x34   : > { %s214_s12 = scalar_lea.sflag [#allocation4], %s213_s5 }
  0x35   : > { %p311_p1 = pneg %p310_p0 }
  0x37   : > { %454 = dma.done.wait (%p311_p1), %s214_s12, 32  }
  0x38   : > { %456 = vsyncadd (%p311_p1), %s214_s12, 4294967264  ;;  %s17_s11 = sadd.s32 1, %s479_s11   ;;  %s625_s6 = smov %s463_s7 }
  0x39   : > { %p14_p2 = scmp.ge.s32.totalorder %s17_s11, 4   ;;  %s626_s7 = smov %s467_s8 }
  0x3a   : > { %s627_s8 = smov %s551_s20  ;;  %s628_s9 = smov %s475_s10 }
  0x3b   : > { %s629_s10 = smov %s631_s14  ;;  %16 = sbr.rel (!%p14_p2) target bundleno = 6 (0x6), region = 72 }
  0x40   :  { %220 = vsyncpa [#allocation3], 1 }
  0x41   :  { %222 = vsyncpa [#allocation3 + $0x1], 1 }
  0x42   :  { %223 = vsyncpa [#allocation4], 1 }
  0x43   :  { %225 = vsyncpa [#allocation4 + $0x1], 1 }

</bundles_post_ra>
